<compile_context>
chip_gen: v7x
topology: tpu7x:2x2x1
jax: 0.10.0
libtpu: 0.0.40
codegen_flags: <defaults>
</compile_context>

<pallas_src>
import functools
import math

import jax
import jax.numpy as jnp
from jax.experimental import pallas as pl
from jax.experimental.pallas import tpu as pltpu


def _round_up(x: int, m: int) -> int:
    return (x + m - 1) // m * m


def _pick_batch_block(batch: int, seq: int, target_rows: int = 256) -> int:
    """Largest divisor of `batch` s.t. the flattened slab has <= ~target rows."""
    cap = max(1, target_rows // max(seq, 1))
    best = 1
    for d in range(1, batch + 1):
        if batch % d == 0 and d <= cap:
            best = d
    return best


def _attention_head_kernel(*refs, qkv_features, has_mask, matmul_dtype):
    if has_mask:
        (q_ref, k_ref, v_ref, mask_ref,
         wq_ref, bq_ref, wk_ref, bk_ref, wv_ref, bv_ref, o_ref) = refs
    else:
        (q_ref, k_ref, v_ref,
         wq_ref, bq_ref, wk_ref, bk_ref, wv_ref, bv_ref, o_ref) = refs
        mask_ref = None

    bb, s, dp = o_ref.shape  # batch-block, seq, padded qkv features

    def project(x_ref, w_ref, b_ref):
        # One big (bb*s, Fin) @ (Fin, dp) MXU matmul per weight.
        x = x_ref[...]          # (bb*s, Fin)
        w = w_ref[...]          # (Fin, dp)
        if matmul_dtype is not None:
            x = x.astype(matmul_dtype)
            w = w.astype(matmul_dtype)
        y = jnp.dot(x, w, preferred_element_type=jnp.float32) + b_ref[...]
        return y.reshape(bb, s, dp)

    Q = project(q_ref, wq_ref, bq_ref)
    K = project(k_ref, wk_ref, bk_ref)
    V = project(v_ref, wv_ref, bv_ref)

    # Fold 1/sqrt(d) into Q (touches S*D elements instead of S*S scores).
    # Use the true (unpadded) feature count for the scale.
    Q = Q * (1.0 / math.sqrt(qkv_features))

    qm, km = Q, K
    if matmul_dtype is not None:
        qm = qm.astype(matmul_dtype)
        km = km.astype(matmul_dtype)
    # Q K^T with the transpose folded into the contraction (no XLU transpose).
    scores = jnp.einsum("bqd,bkd->bqk", qm, km,
                        preferred_element_type=jnp.float32)

    if mask_ref is not None:
        scores = jnp.where(mask_ref[...] != 0, scores, -1e30)

    # Numerically stable softmax; reciprocal goes to the (otherwise idle) EUP.
    scores = scores - jnp.max(scores, axis=-1, keepdims=True)
    p = jnp.exp(scores)
    denom = jnp.sum(p, axis=-1, keepdims=True)
    p = p * pl.reciprocal(denom, approx=True)

    vm = V
    if matmul_dtype is not None:
        p = p.astype(matmul_dtype)
        vm = vm.astype(matmul_dtype)
    out = jnp.einsum("bqk,bkd->bqd", p, vm, preferred_element_type=jnp.float32)
    o_ref[...] = out.astype(o_ref.dtype)


def attention_head(q, k, v, wq, bq, wk, bk, wv, bv, mask=None,
                   matmul_dtype=None):
    """q/k/v: (B, S, Fin); wX: (Fin, D); bX: (1, D). Returns (B, S, D).

    mask: optional boolean/int mask of shape (S, S) or (B, S, S); True = keep.
    matmul_dtype: e.g. jnp.bfloat16 to run MXU operands in bf16 (f32 accum).
    """
    B, S, Fin = q.shape
    D = wq.shape[1]
    Dp = _round_up(D, 128)

    # Pad the qkv feature dim to a lane-dense multiple of 128. Zero weight/bias
    # columns contribute exactly zero everywhere, so results are unchanged and
    # the extra columns are sliced off below.
    if Dp != D:
        pad_w = ((0, 0), (0, Dp - D))
        wq, wk, wv = (jnp.pad(w, pad_w) for w in (wq, wk, wv))
        bq, bk, bv = (jnp.pad(b, pad_w) for b in (bq, bk, bv))

    BB = _pick_batch_block(B, S)
    grid = (B // BB,)

    # Flatten (B, S) so each grid step projects a (BB*S, Fin) slab.
    qf = q.reshape(B * S, Fin)
    kf = k.reshape(B * S, Fin)
    vf = v.reshape(B * S, Fin)

    flat_spec = pl.BlockSpec((BB * S, Fin), lambda b: (b, 0))
    # Weights/biases are grid-invariant (constant index_map).
    # TODO(synk): at large Fin*Dp, avoid double-buffering these constants
    # (single-DMA into scratch or pl.Buffered(1)).
    w_spec = pl.BlockSpec((Fin, Dp), lambda b: (0, 0))
    b_spec = pl.BlockSpec((1, Dp), lambda b: (0, 0))

    in_specs = [flat_spec, flat_spec, flat_spec]
    args = [qf, kf, vf]
    if mask is not None:
        if mask.ndim == 2:
            mask = jnp.broadcast_to(mask, (B,) + mask.shape)
        mask = mask.astype(jnp.int32)
        in_specs.append(pl.BlockSpec((BB, S, S), lambda b: (b, 0, 0)))
        args.append(mask)
    in_specs += [w_spec, b_spec, w_spec, b_spec, w_spec, b_spec]
    args += [wq, bq, wk, bk, wv, bv]

    kernel = functools.partial(
        _attention_head_kernel,
        qkv_features=D,
        has_mask=mask is not None,
        matmul_dtype=matmul_dtype)

    # TODO(synk): for realistic S (>=1k), tile the KV axis with online softmax
    # (flash pattern) instead of materializing the full S x S scores block.
    out = pl.pallas_call(
        kernel,
        out_shape=jax.ShapeDtypeStruct((B, S, Dp), q.dtype),
        grid_spec=pltpu.PrefetchScalarGridSpec(
            num_scalar_prefetch=0,
            grid=grid,
            in_specs=in_specs,
            out_specs=pl.BlockSpec((BB, S, Dp), lambda b: (b, 0, 0)),
        ),
        compiler_params=pltpu.CompilerParams(
            dimension_semantics=("parallel",)),
    )(*args)

    return out[..., :D]


def _reference(q, k, v, wq, bq, wk, bk, wv, bv, mask=None):
    Q = q @ wq + bq
    K = k @ wk + bk
    V = v @ wv + bv
    scores = jnp.einsum("bqd,bkd->bqk", Q, K) / math.sqrt(Q.shape[-1])
    if mask is not None:
        scores = jnp.where(mask, scores, -1e30)
    p = jax.nn.softmax(scores, axis=-1)
    return jnp.einsum("bqk,bkd->bqd", p, V)


if __name__ == "__main__":
    # Small shapes consistent with the module's forward contract.
    B, S, Fin, D = 2, 8, 32, 16  # input_feature_count=32, qkv_feature_count=16

    key = jax.random.PRNGKey(0)
    ks = jax.random.split(key, 9)

    q = jax.random.normal(ks[0], (B, S, Fin), dtype=jnp.float32)
    k = jax.random.normal(ks[1], (B, S, Fin), dtype=jnp.float32)
    v = jax.random.normal(ks[2], (B, S, Fin), dtype=jnp.float32)

    # nn.Linear-style init (uniform +-1/sqrt(fan_in)), stored pre-transposed
    # as (Fin, D) so the kernel computes x @ W + b.
    bound = 1.0 / math.sqrt(Fin)
    init_w = lambda kk: jax.random.uniform(kk, (Fin, D), jnp.float32, -bound, bound)
    init_b = lambda kk: jax.random.uniform(kk, (1, D), jnp.float32, -bound, bound)
    wq, bq = init_w(ks[3]), init_b(ks[4])
    wk, bk = init_w(ks[5]), init_b(ks[6])
    wv, bv = init_w(ks[7]), init_b(ks[8])

    # 1) Unmasked, f32 path.
    out = attention_head(q, k, v, wq, bq, wk, bk, wv, bv)
    out = jax.block_until_ready(out)
    ref = _reference(q, k, v, wq, bq, wk, bk, wv, bv)
    assert out.shape == (B, S, D)
    assert jnp.allclose(out, ref, atol=2e-3, rtol=2e-3), "mismatch (unmasked)"

    # 2) Causal-mask path.
    causal = jnp.tril(jnp.ones((S, S), dtype=bool))
    out_m = attention_head(q, k, v, wq, bq, wk, bk, wv, bv, mask=causal)
    out_m = jax.block_until_ready(out_m)
    ref_m = _reference(q, k, v, wq, bq, wk, bk, wv, bv, mask=causal[None])
    assert jnp.allclose(out_m, ref_m, atol=2e-3, rtol=2e-3), "mismatch (masked)"

    # 3) bf16 MXU-operand path (f32 accumulation) — looser tolerance.
    out_bf = attention_head(q, k, v, wq, bq, wk, bk, wv, bv,
                            matmul_dtype=jnp.bfloat16)
    out_bf = jax.block_until_ready(out_bf)
    assert float(jnp.max(jnp.abs(out_bf - ref))) < 5e-2, "mismatch (bf16)"

    print("KERNEL_OK")
</pallas_src>

<mosaic_0001>
module attributes {stable_mosaic.version = 11 : i64} {
  func.func @_attention_head_kernel(%arg0: i32, %arg1: memref<16x32xf32, #tpu.memory_space<vmem>>, %arg2: memref<16x32xf32, #tpu.memory_space<vmem>>, %arg3: memref<16x32xf32, #tpu.memory_space<vmem>>, %arg4: memref<32x128xf32, #tpu.memory_space<vmem>>, %arg5: memref<1x128xf32, #tpu.memory_space<vmem>>, %arg6: memref<32x128xf32, #tpu.memory_space<vmem>>, %arg7: memref<1x128xf32, #tpu.memory_space<vmem>>, %arg8: memref<32x128xf32, #tpu.memory_space<vmem>>, %arg9: memref<1x128xf32, #tpu.memory_space<vmem>>, %arg10: memref<2x8x128xf32, #tpu.memory_space<vmem>>) attributes {dimension_semantics = [#tpu.dimension_semantics<parallel>], iteration_bounds = array<i64: 1>, scalar_prefetch = 0 : i64, scratch_operands = 0 : i64, tpu.core_type = #tpu.core_type<tc>, window_params = [{transform_indices = @transform_0, window_bounds = array<i64: 16, 32>}, {transform_indices = @transform_1, window_bounds = array<i64: 16, 32>}, {transform_indices = @transform_2, window_bounds = array<i64: 16, 32>}, {pipeline_mode = #tpu.pipeline_mode<synchronous>, transform_indices = @transform_3, window_bounds = array<i64: 32, 128>}, {pipeline_mode = #tpu.pipeline_mode<synchronous>, transform_indices = @transform_4, window_bounds = array<i64: 1, 128>}, {pipeline_mode = #tpu.pipeline_mode<synchronous>, transform_indices = @transform_5, window_bounds = array<i64: 32, 128>}, {pipeline_mode = #tpu.pipeline_mode<synchronous>, transform_indices = @transform_6, window_bounds = array<i64: 1, 128>}, {pipeline_mode = #tpu.pipeline_mode<synchronous>, transform_indices = @transform_7, window_bounds = array<i64: 32, 128>}, {pipeline_mode = #tpu.pipeline_mode<synchronous>, transform_indices = @transform_8, window_bounds = array<i64: 1, 128>}, {transform_indices = @transform_9, window_bounds = array<i64: 2, 8, 128>}]} {
    %c0 = arith.constant 0 : index
    %c0_0 = arith.constant 0 : index
    %0 = vector.load %arg1[%c0, %c0_0] : memref<16x32xf32, #tpu.memory_space<vmem>>, vector<16x32xf32>
    %c0_1 = arith.constant 0 : index
    %c0_2 = arith.constant 0 : index
    %1 = vector.load %arg4[%c0_1, %c0_2] : memref<32x128xf32, #tpu.memory_space<vmem>>, vector<32x128xf32>
    %cst = arith.constant dense<0.000000e+00> : vector<16x128xf32>
    %2 = tpu.matmul %0, %1, %cst {dimension_numbers = #tpu.dot_dimension_numbers<[1], [0], [0], [1], [0, 0, 1, 1], [], []>} : vector<16x32xf32>, vector<32x128xf32>, vector<16x128xf32> -> vector<16x128xf32>
    %c0_3 = arith.constant 0 : index
    %c0_4 = arith.constant 0 : index
    %3 = vector.load %arg5[%c0_3, %c0_4] : memref<1x128xf32, #tpu.memory_space<vmem>>, vector<1x128xf32>
    %4 = vector.broadcast %3 : vector<1x128xf32> to vector<16x128xf32>
    %5 = arith.addf %2, %4 : vector<16x128xf32>
    %6 = vector.shape_cast %5 : vector<16x128xf32> to vector<2x8x128xf32>
    %c0_5 = arith.constant 0 : index
    %c0_6 = arith.constant 0 : index
    %7 = vector.load %arg2[%c0_5, %c0_6] : memref<16x32xf32, #tpu.memory_space<vmem>>, vector<16x32xf32>
    %c0_7 = arith.constant 0 : index
    %c0_8 = arith.constant 0 : index
    %8 = vector.load %arg6[%c0_7, %c0_8] : memref<32x128xf32, #tpu.memory_space<vmem>>, vector<32x128xf32>
    %cst_9 = arith.constant dense<0.000000e+00> : vector<16x128xf32>
    %9 = tpu.matmul %7, %8, %cst_9 {dimension_numbers = #tpu.dot_dimension_numbers<[1], [0], [0], [1], [0, 0, 1, 1], [], []>} : vector<16x32xf32>, vector<32x128xf32>, vector<16x128xf32> -> vector<16x128xf32>
    %c0_10 = arith.constant 0 : index
    %c0_11 = arith.constant 0 : index
    %10 = vector.load %arg7[%c0_10, %c0_11] : memref<1x128xf32, #tpu.memory_space<vmem>>, vector<1x128xf32>
    %11 = vector.broadcast %10 : vector<1x128xf32> to vector<16x128xf32>
    %12 = arith.addf %9, %11 : vector<16x128xf32>
    %13 = vector.shape_cast %12 : vector<16x128xf32> to vector<2x8x128xf32>
    %c0_12 = arith.constant 0 : index
    %c0_13 = arith.constant 0 : index
    %14 = vector.load %arg3[%c0_12, %c0_13] : memref<16x32xf32, #tpu.memory_space<vmem>>, vector<16x32xf32>
    %c0_14 = arith.constant 0 : index
    %c0_15 = arith.constant 0 : index
    %15 = vector.load %arg8[%c0_14, %c0_15] : memref<32x128xf32, #tpu.memory_space<vmem>>, vector<32x128xf32>
    %cst_16 = arith.constant dense<0.000000e+00> : vector<16x128xf32>
    %16 = tpu.matmul %14, %15, %cst_16 {dimension_numbers = #tpu.dot_dimension_numbers<[1], [0], [0], [1], [0, 0, 1, 1], [], []>} : vector<16x32xf32>, vector<32x128xf32>, vector<16x128xf32> -> vector<16x128xf32>
    %c0_17 = arith.constant 0 : index
    %c0_18 = arith.constant 0 : index
    %17 = vector.load %arg9[%c0_17, %c0_18] : memref<1x128xf32, #tpu.memory_space<vmem>>, vector<1x128xf32>
    %18 = vector.broadcast %17 : vector<1x128xf32> to vector<16x128xf32>
    %19 = arith.addf %16, %18 : vector<16x128xf32>
    %20 = vector.shape_cast %19 : vector<16x128xf32> to vector<2x8x128xf32>
    %cst_19 = arith.constant 2.500000e-01 : f32
    %21 = vector.broadcast %cst_19 : f32 to vector<2x8x128xf32>
    %22 = arith.mulf %6, %21 : vector<2x8x128xf32>
    "tpu.trace_start"() <{level = 10 : i32, message = "bqd,bkd->bqk"}> : () -> ()
    %cst_20 = arith.constant dense<0.000000e+00> : vector<2x8x8xf32>
    %23 = tpu.matmul %22, %13, %cst_20 {dimension_numbers = #tpu.dot_dimension_numbers<[2], [2], [1], [1], [0, 0, 0, 1, 1, 1], [0], [0]>} : vector<2x8x128xf32>, vector<2x8x128xf32>, vector<2x8x8xf32> -> vector<2x8x8xf32>
    "tpu.trace_stop"() : () -> ()
    %cst_21 = arith.constant dense<0xFF800000> : vector<2x8xf32>
    %24 = vector.multi_reduction <maximumf>, %23, %cst_21 [2] : vector<2x8x8xf32> to vector<2x8xf32>
    %25 = vector.shape_cast %24 : vector<2x8xf32> to vector<2x8x1xf32>
    %26 = vector.broadcast %25 : vector<2x8x1xf32> to vector<2x8x8xf32>
    %27 = arith.subf %23, %26 : vector<2x8x8xf32>
    %28 = math.exp %27 : vector<2x8x8xf32>
    %cst_22 = arith.constant dense<0.000000e+00> : vector<2x8xf32>
    %29 = vector.multi_reduction <add>, %28, %cst_22 [2] : vector<2x8x8xf32> to vector<2x8xf32>
    %30 = vector.shape_cast %29 : vector<2x8xf32> to vector<2x8x1xf32>
    %31 = tpu.reciprocal %30 {approx = true} : vector<2x8x1xf32> -> vector<2x8x1xf32>
    %32 = vector.broadcast %31 : vector<2x8x1xf32> to vector<2x8x8xf32>
    %33 = arith.mulf %28, %32 : vector<2x8x8xf32>
    "tpu.trace_start"() <{level = 10 : i32, message = "bqk,bkd->bqd"}> : () -> ()
    %cst_23 = arith.constant dense<0.000000e+00> : vector<2x8x128xf32>
    %34 = tpu.matmul %33, %20, %cst_23 {dimension_numbers = #tpu.dot_dimension_numbers<[2], [1], [1], [2], [0, 0, 0, 1, 1, 2], [0], [0]>} : vector<2x8x8xf32>, vector<2x8x128xf32>, vector<2x8x128xf32> -> vector<2x8x128xf32>
    "tpu.trace_stop"() : () -> ()
    %c0_24 = arith.constant 0 : index
    %c0_25 = arith.constant 0 : index
    %c0_26 = arith.constant 0 : index
    %35 = vector.load %arg10[%c0_24, %c0_25, %c0_26] : memref<2x8x128xf32, #tpu.memory_space<vmem>>, vector<2x8x128xf32>
    tpu.vector_store %arg10[%c0_24, %c0_25, %c0_26], %34 {strides = array<i32>} : memref<2x8x128xf32, #tpu.memory_space<vmem>>, vector<2x8x128xf32>,
    return
  }
  func.func @transform_0(%arg0: i32) -> (i32, i32) {
    %c0_i32 = arith.constant 0 : i32
    %c0_i32_0 = arith.constant 0 : i32
    return %arg0, %c0_i32 : i32, i32
  }
  func.func @transform_1(%arg0: i32) -> (i32, i32) {
    %c0_i32 = arith.constant 0 : i32
    %c0_i32_0 = arith.constant 0 : i32
    return %arg0, %c0_i32 : i32, i32
  }
  func.func @transform_2(%arg0: i32) -> (i32, i32) {
    %c0_i32 = arith.constant 0 : i32
    %c0_i32_0 = arith.constant 0 : i32
    return %arg0, %c0_i32 : i32, i32
  }
  func.func @transform_3(%arg0: i32) -> (i32, i32) {
    %c0_i32 = arith.constant 0 : i32
    %c0_i32_0 = arith.constant 0 : i32
    %c0_i32_1 = arith.constant 0 : i32
    return %c0_i32, %c0_i32_0 : i32, i32
  }
  func.func @transform_4(%arg0: i32) -> (i32, i32) {
    %c0_i32 = arith.constant 0 : i32
    %c0_i32_0 = arith.constant 0 : i32
    %c0_i32_1 = arith.constant 0 : i32
    return %c0_i32, %c0_i32_0 : i32, i32
  }
  func.func @transform_5(%arg0: i32) -> (i32, i32) {
    %c0_i32 = arith.constant 0 : i32
    %c0_i32_0 = arith.constant 0 : i32
    %c0_i32_1 = arith.constant 0 : i32
    return %c0_i32, %c0_i32_0 : i32, i32
  }
  func.func @transform_6(%arg0: i32) -> (i32, i32) {
    %c0_i32 = arith.constant 0 : i32
    %c0_i32_0 = arith.constant 0 : i32
    %c0_i32_1 = arith.constant 0 : i32
    return %c0_i32, %c0_i32_0 : i32, i32
  }
  func.func @transform_7(%arg0: i32) -> (i32, i32) {
    %c0_i32 = arith.constant 0 : i32
    %c0_i32_0 = arith.constant 0 : i32
    %c0_i32_1 = arith.constant 0 : i32
    return %c0_i32, %c0_i32_0 : i32, i32
  }
  func.func @transform_8(%arg0: i32) -> (i32, i32) {
    %c0_i32 = arith.constant 0 : i32
    %c0_i32_0 = arith.constant 0 : i32
    %c0_i32_1 = arith.constant 0 : i32
    return %c0_i32, %c0_i32_0 : i32, i32
  }
  func.func @transform_9(%arg0: i32) -> (i32, i32, i32) {
    %c0_i32 = arith.constant 0 : i32
    %c0_i32_0 = arith.constant 0 : i32
    %c0_i32_1 = arith.constant 0 : i32
    return %arg0, %c0_i32, %c0_i32_0 : i32, i32, i32
  }
}

</mosaic_0001>

<bundles_post_ra>
// kernel: tpu_custom_call.1
= control target key start
LH: loop header
LB: loop body
LE: loop exit
PB: predicated region body
PF: predicated region fallthrough
CT: control target
= control target key end

     0   :  { %14 = vsyncpa [#allocation3], 0  ;;  %s1240_s0 = inlined_call_operand.hbm [shape: f32[16,32], index: 0, kind: input, shape index: {}]   ;;  %s1241_s1 = inlined_call_operand.hbm [shape: f32[16,32], index: 1, kind: input, shape index: {}]   ;;  %s1242_s2 = inlined_call_operand.hbm [shape: f32[16,32], index: 2, kind: input, shape index: {}]   ;;  %s1243_s3 = inlined_call_operand.hbm [shape: f32[32,128], index: 3, kind: input, shape index: {}]   ;;  %s1244_s4 = inlined_call_operand.vmem [shape: f32[1,128], index: 4, kind: input, shape index: {}]   ;;  %s1245_s5 = inlined_call_operand.hbm [shape: f32[32,128], index: 5, kind: input, shape index: {}]   ;;  %s1246_s6 = inlined_call_operand.vmem [shape: f32[1,128], index: 6, kind: input, shape index: {}]   ;;  %s1247_s7 = inlined_call_operand.hbm [shape: f32[32,128], index: 7, kind: input, shape index: {}]   ;;  %s1248_s8 = inlined_call_operand.vmem [shape: f32[1,128], index: 8, kind: input, shape index: {}]   ;;  %s1249_s9 = inlined_call_operand.hbm [shape: f32[2,8,128], index: 9, kind: output, shape index: {}]  }
   0x1   :  { %15 = vsyncpa [#allocation6], 0 }
   0x2   :  { %16 = vsyncpa [#allocation9], 0 }
   0x3   :  { %17 = vsyncpa [#allocation12], 0 }
   0x4   :  { %18 = vsyncpa [#allocation4], 0  ;;  %s1028_s30 = smov [#allocation5]   ;;  %s1029_s11 = smov [#allocation8]  }
   0x5   :  { %s36_s10 = sshll.u32 %s1028_s30, 4  ;;  %s60_s12 = sshll.u32 %s1029_s11, 4  ;;  %s37_s10 = int_to_ptr.vmem [resolvable:$true] %s36_s10  ;;  %s1089_s12 = int_to_ptr.vmem [resolvable:$true] %s60_s12 }
   0x6   :  { %s864_s15 = scalar_lea.hbm %s1241_s1, 256 }
   0x7   :  { %p865_p0 = scmp.ne.s32.totalorder %s1241_s1, %s864_s15  ;;  %p868_p1 = scmp.lt.u32.totalorder %s864_s15, %s1241_s1 }
   0x9   :  { %p870_p2 = pnand %p868_p1, %p865_p0 }
   0xb   :  { %873 = shalt.err (!%p870_p2)
}
   0xc   :  { %s874_s20 = scalar_lea.vmem %s37_s10, 256  ;;  %p879_p4 = scmp.lt.s32.totalorder %s37_s10, %s37_s10 }
   0xd   :  { %p875_p3 = scmp.ne.s32.totalorder %s37_s10, %s874_s20  ;;  %p880_p5 = scmp.lt.s32.totalorder %s874_s20, %s874_s20 }
   0xf   :  { %p881_p6 = por %p880_p5, %p879_p4 }
  0x11   :  { %p882_p7 = pnand %p881_p6, %p875_p3 }
  0x13   :  { %885 = shalt.err (!%p882_p7)
}
  0x14   :  { %s1030_s21 = smov 128   ;;  %s1031_s22 = smov 8  }
  0x15   :  { %42 = dma.hbm_to_vmem [thread:$0]  %s1241_s1, 256, %s37_s10, [#allocation6], %s1030_s21, %s1030_s21, %s1031_s22  }
  0x16   :  { %s886_s27 = scalar_lea.hbm %s1243_s3, 512 }
  0x17   :  { %p887_p8 = scmp.ne.s32.totalorder %s1243_s3, %s886_s27  ;;  %p890_p9 = scmp.lt.u32.totalorder %s886_s27, %s1243_s3 }
  0x19   :  { %p892_p10 = pnand %p890_p9, %p887_p8 }
  0x1b   :  { %895 = shalt.err (!%p892_p10)
}
  0x1c   :  { %s896_s13 = scalar_lea.vmem %s1089_s12, 512  ;;  %p901_p12 = scmp.lt.s32.totalorder %s1089_s12, %s1089_s12 }
  0x1d   :  { %p897_p11 = scmp.ne.s32.totalorder %s1089_s12, %s896_s13  ;;  %p902_p13 = scmp.lt.s32.totalorder %s896_s13, %s896_s13 }
  0x1f   :  { %p903_p0 = por %p902_p13, %p901_p12 }
  0x21   :  { %p904_p1 = pnand %p903_p0, %p897_p11 }
  0x23   :  { %907 = shalt.err (!%p904_p1)
}
  0x24   :  { %66 = dma.hbm_to_vmem [thread:$0]  %s1243_s3, 512, %s1089_s12, [#allocation9], %s1030_s21, %s1030_s21, %s1031_s22  }
  0x25   :  { %s1032_s14 = smov [#allocation2]   ;;  %s1033_s16 = smov [#allocation7]  }
  0x26   :  { %s24_s15 = sshll.u32 %s1032_s14, 4  ;;  %s48_s17 = sshll.u32 %s1033_s16, 4  ;;  %s25_s15 = int_to_ptr.vmem [resolvable:$true] %s24_s15  ;;  %s1126_s17 = int_to_ptr.vmem [resolvable:$true] %s48_s17 }
  0x27   :  { %s908_s20 = scalar_lea.hbm %s1240_s0, 256 }
  0x28   :  { %p909_p2 = scmp.ne.s32.totalorder %s1240_s0, %s908_s20  ;;  %p912_p3 = scmp.lt.u32.totalorder %s908_s20, %s1240_s0 }
  0x2a   :  { %p914_p4 = pnand %p912_p3, %p909_p2 }
  0x2c   :  { %917 = shalt.err (!%p914_p4)
}
  0x2d   :  { %s918_s3 = scalar_lea.vmem %s25_s15, 256  ;;  %p923_p6 = scmp.lt.s32.totalorder %s25_s15, %s25_s15 }
  0x2e   :  { %p919_p5 = scmp.ne.s32.totalorder %s25_s15, %s918_s3  ;;  %p924_p7 = scmp.lt.s32.totalorder %s918_s3, %s918_s3 }
  0x30   :  { %p925_p8 = por %p924_p7, %p923_p6 }
  0x32   :  { %p926_p9 = pnand %p925_p8, %p919_p5 }
  0x34   :  { %929 = shalt.err (!%p926_p9)
}
  0x35   :  { %30 = dma.hbm_to_vmem [thread:$0]  %s1240_s0, 256, %s25_s15, [#allocation3], %s1030_s21, %s1030_s21, %s1031_s22  }
  0x36   :  { %s930_s30 = scalar_lea.hbm %s1242_s2, 256 }
  0x37   :  { %p931_p10 = scmp.ne.s32.totalorder %s1242_s2, %s930_s30  ;;  %p934_p11 = scmp.lt.u32.totalorder %s930_s30, %s1242_s2 }
  0x39   :  { %p936_p12 = pnand %p934_p11, %p931_p10 }
  0x3b   :  { %939 = shalt.err (!%p936_p12)
}
  0x3c   :  { %s940_s14 = scalar_lea.vmem %s1126_s17, 256  ;;  %p945_p0 = scmp.lt.s32.totalorder %s1126_s17, %s1126_s17 }
  0x3d   :  { %p941_p13 = scmp.ne.s32.totalorder %s1126_s17, %s940_s14  ;;  %p946_p1 = scmp.lt.s32.totalorder %s940_s14, %s940_s14 }
  0x3f   :  { %p947_p2 = por %p946_p1, %p945_p0 }
  0x41   :  { %p948_p3 = pnand %p947_p2, %p941_p13 }
  0x43   :  { %951 = shalt.err (!%p948_p3)
}
  0x44   :  { %54 = dma.hbm_to_vmem [thread:$0]  %s1242_s2, 256, %s1126_s17, [#allocation6], %s1030_s21, %s1030_s21, %s1031_s22  }
  0x45   :  { %s1034_s16 = smov [#allocation10]   ;;  %s1035_s19 = smov [#allocation11]  }
  0x46   :  { %s74_s18 = sshll.u32 %s1034_s16, 4  ;;  %s88_s20 = sshll.u32 %s1035_s19, 4  ;;  %s75_s18 = int_to_ptr.vmem [resolvable:$true] %s74_s18  ;;  %s1163_s20 = int_to_ptr.vmem [resolvable:$true] %s88_s20 }
  0x47   :  { %s952_s25 = scalar_lea.hbm %s1245_s5, 512 }
  0x48   :  { %p953_p4 = scmp.ne.s32.totalorder %s1245_s5, %s952_s25  ;;  %p956_p5 = scmp.lt.u32.totalorder %s952_s25, %s1245_s5 }
  0x4a   :  { %p958_p6 = pnand %p956_p5, %p953_p4 }
  0x4c   :  { %961 = shalt.err (!%p958_p6)
}
  0x4d   :  { %s962_s2 = scalar_lea.vmem %s75_s18, 512  ;;  %p967_p8 = scmp.lt.s32.totalorder %s75_s18, %s75_s18 }
  0x4e   :  { %p963_p7 = scmp.ne.s32.totalorder %s75_s18, %s962_s2  ;;  %p968_p9 = scmp.lt.s32.totalorder %s962_s2, %s962_s2 }
  0x50   :  { %p969_p10 = por %p968_p9, %p967_p8 }
  0x52   :  { %p970_p11 = pnand %p969_p10, %p963_p7 }
  0x54   :  { %973 = shalt.err (!%p970_p11)
}
  0x55   :  { %80 = dma.hbm_to_vmem [thread:$0]  %s1245_s5, 512, %s75_s18, [#allocation9], %s1030_s21, %s1030_s21, %s1031_s22  }
  0x56   :  { %s974_s11 = scalar_lea.hbm %s1247_s7, 512 }
  0x57   :  { %p975_p12 = scmp.ne.s32.totalorder %s1247_s7, %s974_s11  ;;  %p978_p13 = scmp.lt.u32.totalorder %s974_s11, %s1247_s7 }
  0x59   :  { %p980_p0 = pnand %p978_p13, %p975_p12 }
  0x5b   :  { %983 = shalt.err (!%p980_p0)
}
  0x5c   :  { %s984_s0 = scalar_lea.vmem %s1163_s20, 512  ;;  %p989_p2 = scmp.lt.s32.totalorder %s1163_s20, %s1163_s20 }
  0x5d   :  { %p985_p1 = scmp.ne.s32.totalorder %s1163_s20, %s984_s0  ;;  %p990_p3 = scmp.lt.s32.totalorder %s984_s0, %s984_s0 }
  0x5f   :  { %p991_p4 = por %p990_p3, %p989_p2 }
  0x61   :  { %p992_p5 = pnand %p991_p4, %p985_p1 }
  0x63   :  { %995 = shalt.err (!%p992_p5)
}
  0x64   :  { %94 = dma.hbm_to_vmem [thread:$0]  %s1247_s7, 512, %s1163_s20, [#allocation12], %s1030_s21, %s1030_s21, %s1031_s22  }
  0x65   :  { %1018 = dma.done.wait [#allocation3], 256  }
  0x66   :  { %1019 = vsyncadd [#allocation3], 4294967040 }
  0x67   :  { %1020 = dma.done.wait [#allocation6], 512  }
  0x68   :  { %1021 = vsyncadd [#allocation6], 4294966784 }
  0x69   :  { %1022 = dma.done.wait [#allocation9], 1024  }
  0x6a   :  { %1023 = vsyncadd [#allocation9], 4294966272 }
  0x6b   :  { %1024 = dma.done.wait [#allocation12], 512  }
  0x6c   :  { %1025 = vsyncadd [#allocation12], 4294966784  ;;  %v212_v0 = vld [vmem:[#allocation10] sm:$0xff]  ;;  %v213_v1 = vld [vmem:[#allocation10 + $0x8] sm:$0xff]  ;;  %vm128_vm0 = vcmask 261120   ;;  %v1036_v16 = vmov 0.0  }
  0x6d   :  { %v117_v2 = vld [vmem:[#allocation8] sm:$0xff]  ;;  %v829_v3 = vpack.c.bf16 %v213_v1, %v212_v0  ;;  %v118_v4 = vld [vmem:[#allocation8 + $0x8] sm:$0xff]  ;;  %v214_v5 = vld [vmem:[#allocation10 + $0x10] sm:$0xff]  ;;  %vm1037_vm1 = vmmov 0   ;;  %vm540_vm2 = vcmask 64512   ;;  %s1038_s20 = smov [#allocation13]  }
  0x6e   :  { %v215_v6 = vld [vmem:[#allocation10 + $0x18] sm:$0xff]  ;;  %v821_v7 = vpack.c.bf16 %v118_v4, %v117_v2  ;;  %v119_v9 = vld [vmem:[#allocation8 + $0x10] sm:$0xff]  ;;  %v210_v11 = vld [vmem:[#allocation5] sm:$0xff] }
  0x6f   :  { %v833_v8 = vpack.c.bf16 %v215_v6, %v214_v5  ;;  %v120_v10 = vld [vmem:[#allocation8 + $0x18] sm:$0xff]  ;;  %830 = vmatprep.subr.bf16.mxu1 %v829_v3  ;;  %787 = vmatprep.mubr.msk.f32.mxu1 %vm128_vm0, %v210_v11  ;;  %v115_v13 = vld [vmem:[#allocation2] sm:$0xff]  ;;  %v211_v14 = vld [vmem:[#allocation5 + $0x8] sm:$0xff] }
  0x70   :  { %v825_v12 = vpack.c.bf16 %v120_v10, %v119_v9  ;;  %822 = vmatprep.subr.bf16.mxu0 %v821_v7  ;;  %832 = vmatpush3.bf16.msra.mxu1 %v829_v3  ;;  %v116_v15 = vld [vmem:[#allocation2 + $0x8] sm:$0xff]  ;;  %v734_v17 = vld [vmem:[%s1246_s6] ss:$0 sm:$0xff]  ;;  %v306_v29 = vld [vmem:[#allocation11] sm:$0xff] }
  0x71   :  { %824 = vmatpush3.bf16.msra.mxu0 %v821_v7  ;;  %834 = vmatprep.subr.bf16.mxu1 %v833_v8  ;;  %v731_v19 = vld [vmem:[%s1244_s4] ss:$0 sm:$0xff]  ;;  %v307_v30 = vld [vmem:[#allocation11 + $0x8] sm:$0xff]  ;;  %v309_v33 = vld [vmem:[#allocation11 + $0x18] sm:$0xff] }
  0x72   :  { %826 = vmatprep.subr.bf16.mxu0 %v825_v12  ;;  %776 = vmatprep.mubr.msk.f32.mxu0 %vm128_vm0, %v115_v13  ;;  %v308_v31 = vld [vmem:[#allocation11 + $0x10] sm:$0xff]  ;;  %v837_v32 = vpack.c.bf16 %v307_v30, %v306_v29  ;;  %v305_v36 = vld [vmem:[#allocation7 + $0x8] sm:$0xff] }
  0x73   :  { %v304_v34 = vld [vmem:[#allocation7] sm:$0xff]  ;;  %v841_v35 = vpack.c.bf16 %v309_v33, %v308_v31 }
  0x74   :  { %836 = vmatpush3.bf16.msra.mxu1 %v833_v8  ;;  %v737_v54 = vld [vmem:[%s1248_s8] ss:$0 sm:$0xff]  ;;  %s716_s8 = sshll.u32 %s1038_s20, 4  ;;  %s717_s8 = int_to_ptr.vmem [resolvable:$true] %s716_s8 }
  0x75   :  { %828 = vmatpush3.bf16.msra.mxu0 %v825_v12  ;;  %801 = vmatprep.subr.mxu1 %v1036_v16  ;;  %s996_s23 = scalar_lea.vmem %s717_s8, 256  ;;  %p1001_p7 = scmp.lt.s32.totalorder %s717_s8, %s717_s8 }
  0x76   :  { %838 = vmatprep.subr.bf16.mxu0 %v837_v32  ;;  %p997_p6 = scmp.ne.s32.totalorder %s717_s8, %s996_s23  ;;  %p1002_p8 = scmp.lt.s32.totalorder %s996_s23, %s996_s23 }
  0x77   :  { %788 = vmatmul.mubr.msk.f32.vlgmr.msra.gmra.mrb[0].mxu1 %vm128_vm0, %v211_v14 }
  0x78   :  { %777 = vmatmul.mubr.msk.f32.vlgmr.msra.gmra.mrb[0].mxu0 %vm128_vm0, %v116_v15  ;;  %803 = vmatprep.mubr.msk.f32.mxu1 %vm1037_vm1, %v1036_v16  ;;  %p1003_p9 = por %p1002_p8, %p1001_p7 }
  0x79   :  { %798 = vmatprep.mubr.msk.f32.mxu0 %vm128_vm0, %v304_v34  ;;  %840 = vmatpush3.bf16.msra.mxu0 %v837_v32 }
  0x7a   :  { %842 = vmatprep.subr.bf16.mxu0 %v841_v35  ;;  %p1004_p10 = pnand %p1003_p9, %p997_p6 }
  0x7d   :  { %844 = vmatpush3.bf16.msra.mxu0 %v841_v35 }
  0x7e   :  { %811 = vmatprep.subr.mxu0 %v1036_v16 }
  0x80   :  { %799 = vmatmul.mubr.msk.f32.vlgmr.msra.gmra.mrb[2].mxu0 %vm128_vm0, %v305_v36 }
  0x81   :  { %813 = vmatprep.mubr.msk.f32.mxu0 %vm1037_vm1, %v1036_v16 }
 0x14a   :  { %v789_v18 = vpop.f32.mrb[0].mxu1 }
 0x14b   :  { %v778_v20 = vpop.f32.mrb[0].mxu0  ;;  %v295_v21 = vpop.f32.mrb[1].mxu1  ;;  %v301_v27 = vadd.f32 %v789_v18, %v734_v17 }
 0x14c   :  { %v296_v22 = vadd.f32 %v734_v17, %v295_v21  ;;  %v201_v23 = vpop.f32.mrb[1].mxu0  ;;  %v207_v25 = vadd.f32 %v778_v20, %v731_v19 }
 0x14d   :  { %v202_v24 = vadd.f32 %v731_v19, %v201_v23 }
 0x14e   :  { %802 = vmatpush3.xpose.msra.mxu1 %v296_v22  ;;  %v399_v28 = vmul.f32 0.25, %v207_v25 }
 0x14f   :  { %v398_v26 = vmul.f32 0.25, %v202_v24  ;;  %806 = vmatprep.subr.mxu1 %v1036_v16 }
 0x151   :  { %804 = vmatmul.mubr.f32.vlgmr.msra.gmra.mrb[2].mxu1 %v398_v26 }
 0x152   :  { %807 = vmatpush3.xpose.msra.mxu1 %v301_v27  ;;  %808 = vmatprep.mubr.msk.f32.mxu1 %vm1037_vm1, %v1036_v16 }
 0x153   :  { %816 = vmatprep.subr.mxu1 %v1036_v16  ;;  %v800_v53 = vpop.f32.mrb[2].mxu0 }
 0x154   :  { %v389_v55 = vpop.f32.mrb[3].mxu0  ;;  %v395_v57 = vadd.f32 %v800_v53, %v737_v54 }
 0x155   :  { %809 = vmatmul.mubr.f32.vlgmr.msra.gmra.mrb[4].mxu1 %v399_v28  ;;  %v390_v56 = vadd.f32 %v737_v54, %v389_v55 }
 0x156   :  { %818 = vmatprep.mubr.msk.f32.mxu1 %vm1037_vm1, %v1036_v16  ;;  %817 = vmatpush3.msra.mxu1 %v395_v57 }
 0x157   :  { %812 = vmatpush3.msra.mxu0 %v390_v56 }
 0x224   :  { %v466_v37 = vpop.f32.mrb[2].mxu1 }
 0x225   :  { %v805_v38 = vpop.f32.mrb[3].mxu1  ;;  %v541_v39 = vsel %vm540_vm2, %v466_v37, -inf }
 0x226   :  { %542 = vmax.xlane.f32.xlu0 %v541_v39 }
 0x228   :  { %v536_v40 = vpop.f32.mrb[4].mxu1 }
 0x229   :  { %v810_v41 = vpop.f32.mrb[5].mxu1  ;;  %v544_v42 = vsel %vm540_vm2, %v536_v40, -inf }
 0x22a   :  { %545 = vmax.xlane.f32.xlu0 %v544_v42 }
 0x2b3   :  { %v543_v43 = vpop.xlane.xlu0 %542 }
 0x2b4   :  { %v547_v44 = vsub.f32 %v466_v37, %v543_v43 }
 0x2b6   :  { %v549_v45 = vmul.f32 1.442695, %v547_v44 }
 0x2b7   :  { %v546_v46 = vpop.xlane.xlu0 %545 }
 0x2b8   :  { %856 = vpow2.f32 %v549_v45  ;;  %v548_v47 = vsub.f32 %v536_v40, %v546_v46 }
 0x2ba   :  { %v551_v48 = vmul.f32 1.442695, %v548_v47 }
 0x2bc   :  { %858 = vpow2.f32 %v551_v48 }
 0x2c2   :  { %v857_v49 = vpop.eup %856 }
 0x2c3   :  { %v553_v50 = vsel %vm540_vm2, %v857_v49, 0.0 }
 0x2c4   :  { %554 = vadd.xlane.f32.xlu1 %v553_v50 }
 0x2c6   :  { %v859_v51 = vpop.eup %858 }
 0x2c7   :  { %v556_v52 = vsel %vm540_vm2, %v859_v51, 0.0 }
 0x2c8   :  { %557 = vadd.xlane.f32.xlu1 %v556_v52 }
 0x351   :  { %v555_v58 = vpop.xlane.xlu1 %554 }
 0x352   :  { %860 = vrcp.f32 %v555_v58 }
 0x355   :  { %v558_v59 = vpop.xlane.xlu1 %557 }
 0x356   :  { %862 = vrcp.f32 %v558_v59 }
 0x35c   :  { %v861_v60 = vpop.eup %860 }
 0x35d   :  { %v561_v61 = vmul.f32 %v861_v60, %v857_v49 }
 0x35f   :  { %814 = vmatmul.mubr.msk.f32.vlgmr.msra.gmra.mrb[4].mxu0 %vm540_vm2, %v561_v61 }
 0x360   :  { %v863_v62 = vpop.eup %862 }
 0x361   :  { %v562_v63 = vmul.f32 %v863_v62, %v859_v51 }
 0x363   :  { %819 = vmatmul.mubr.msk.f32.vlgmr.msra.gmra.mrb[6].mxu1 %vm540_vm2, %v562_v63 }
 0x432   :  { %v632_v0 = vpop.f32.mrb[4].mxu0 }
 0x433   :  { %709 = vst [vmem:[#allocation13] sm:$0xff] %v632_v0  ;;  %v815_v1 = vpop.f32.mrb[5].mxu0 }
 0x436   :  { %v705_v2 = vpop.f32.mrb[6].mxu1 }
 0x437   :  { %710 = vst [vmem:[#allocation13 + $0x8] sm:$0xff] %v705_v2  ;;  %v820_v3 = vpop.f32.mrb[7].mxu1 }
 0x438   :  { %1007 = shalt.err (!%p1004_p10)
}
 0x439   :  { %s1008_s26 = scalar_lea.hbm %s1249_s9, 256 }
 0x43a   :  { %p1009_p11 = scmp.ne.s32.totalorder %s1249_s9, %s1008_s26  ;;  %p1012_p12 = scmp.lt.u32.totalorder %s1008_s26, %s1249_s9 }
 0x43c   :  { %p1014_p13 = pnand %p1012_p12, %p1009_p11 }
 0x43e   :  { %1017 = shalt.err (!%p1014_p13)
}
 0x43f   :  { %722 = dma.vmem_to_hbm [thread:$0]  %s717_s8, 256, %s1249_s9, [#allocation4], %s1030_s21, %s1030_s21, %s1031_s22  }
 0x440   :  { %1026 = dma.done.wait [#allocation4], 256  }
 0x441   :  { %1027 = vsyncadd [#allocation4], 4294967040 }
 0x442   :  { %726 = vsyncpa [#allocation3], 1 }
 0x443   :  { %727 = vsyncpa [#allocation6], 1 }
 0x444   :  { %728 = vsyncpa [#allocation9], 1 }
 0x445   :  { %729 = vsyncpa [#allocation12], 1 }
 0x446   :  { %730 = vsyncpa [#allocation4], 1 }

</bundles_post_ra>
